<compile_context>
chip_gen: v6e
topology: v6e:2x2x1
jax: 0.10.0
libtpu: 0.0.40
codegen_flags: <defaults>
</compile_context>

<pallas_src>
import functools

import jax
import jax.numpy as jnp
import numpy as np
from jax.experimental import pallas as pl
from jax.experimental.pallas import tpu as pltpu

_LANE = 128      # TPU lane width
_TB_MAX = 4096   # max batch tile (per review: sweep 2048-8192; VMEM use is tiny)


def _cdiv(a, b):
    return -(-a // b)


def _mlp_kernel(x_ref, w1_ref, b1_ref, w2_ref, b2_ref, w3_ref, b3_ref, y_ref):
    """Transposed 3-layer tanh MLP (one fused output, no in-kernel split).

    Shapes (per grid step, batch tile TB on the lane axis):
      x_ref  : [d_in, TB]
      w1_ref : [H, d_in]   b1_ref : [H, 1]
      w2_ref : [H, H]      b2_ref : [H, 1]
      w3_ref : [d_in, H]   b3_ref : [d_in, 1]
      y_ref  : [d_in, TB]
    """
    act = w2_ref.dtype  # bf16 on the bf16 path -> bf16 tanh on v6e/v7x EUP
    x = x_ref[...]
    h1 = jnp.tanh(
        (jnp.dot(w1_ref[...], x, preferred_element_type=jnp.float32)
         + b1_ref[...]).astype(act))
    h2 = jnp.tanh(
        (jnp.dot(w2_ref[...], h1, preferred_element_type=jnp.float32)
         + b2_ref[...]).astype(act))
    y = jnp.dot(w3_ref[...], h2, preferred_element_type=jnp.float32) + b3_ref[...]
    y_ref[...] = y.astype(y_ref.dtype)


def _choose_batch_tile(batch):
    """Lane-pad the batch and pick (tile, padded) with bounded padding.

    - tiles are multiples of 128 (lane width)
    - at least 2 grid steps once lane-padded batch >= 256 (v7x megacore)
    - padding per tile is bounded (~<=128 cols), unlike the old
      round-up-to-whole-tiles scheme.
    """
    lane_padded = _cdiv(batch, _LANE) * _LANE
    ntiles = _cdiv(lane_padded, _TB_MAX)
    if ntiles == 1 and lane_padded >= 2 * _LANE:
        ntiles = 2  # feed both TensorCores on v7x; harmless on v5e/v6e
    tb = _LANE * _cdiv(lane_padded, _LANE * ntiles)
    padded = tb * ntiles
    return tb, padded


def hnn_mlp_pallas(x_t, w1t, b1, w2t, b2, w3t, b3):
    """Runs the fused MLP kernel on a [feature, batch] input; returns y^T."""
    d_in, batch = x_t.shape
    tb, padded = _choose_batch_tile(batch)
    if padded != batch:
        x_t = jnp.pad(x_t, ((0, 0), (0, padded - batch)))
    grid = (padded // tb,)
    out_dtype = x_t.dtype  # bf16 outputs on the bf16 path (halved writeback)

    def resident(arr):
        # Same block index every grid step -> weight stays resident in VMEM.
        return pl.BlockSpec(arr.shape, lambda i: (0, 0))

    y_t = pl.pallas_call(
        _mlp_kernel,
        out_shape=jax.ShapeDtypeStruct((d_in, padded), out_dtype),
        grid=grid,
        in_specs=[
            pl.BlockSpec((d_in, tb), lambda i: (0, i)),   # x^T: batch on lanes
            resident(w1t), resident(b1),
            resident(w2t), resident(b2),
            resident(w3t), resident(b3),
        ],
        out_specs=pl.BlockSpec((d_in, tb), lambda i: (0, i)),
        compiler_params=pltpu.CompilerParams(
            dimension_semantics=("parallel",),        # megacore split on v7x
            vmem_limit_bytes=32 * 1024 * 1024,        # plenty even at TB=4096
        ),
    )(x_t, w1t, b1, w2t, b2, w3t, b3)
    return y_t  # [d_in, padded], caller strips padding


@functools.partial(jax.jit, static_argnames=("split", "half"))
def _hnn_forward(x, w1t, b1, w2t, b2, w3t, b3, *, split, half):
    """Standard-layout entry: x [batch, d_in] -> y [batch, d_in] or (q, p).

    Only two relayout passes (x.T in, y.T out); the q/p column split fuses
    with the output transpose inside XLA.
    """
    batch = x.shape[0]
    x_t = x.T.astype(w1t.dtype)                  # batch onto the lane axis
    y_t = hnn_mlp_pallas(x_t, w1t, b1, w2t, b2, w3t, b3)
    y = y_t[:, :batch].T                         # single relayout + unpad
    if split:
        return y[:, :half], y[:, half:]
    return y


@jax.jit
def _hnn_forward_transposed(x_t, w1t, b1, w2t, b2, w3t, b3):
    """Transposed-layout entry: x^T [d_in, batch] -> y^T [d_in, batch].

    No wrapper-side relayout passes at all (for callers that keep the
    [feature, batch] layout end-to-end).
    """
    batch = x_t.shape[1]
    y_t = hnn_mlp_pallas(x_t.astype(w1t.dtype), w1t, b1, w2t, b2, w3t, b3)
    return y_t[:, :batch]


def permutation_tensor(n, assume_canonical_coords=True):
    """Mirrors HNN.permutation_tensor (both branches). Unused in forward()."""
    if assume_canonical_coords:
        M = np.eye(n, dtype=np.float32)
        M = np.concatenate([M[n // 2:], -M[: n // 2]], axis=0)
    else:
        M = np.ones((n, n), dtype=np.float32)
        M *= 1.0 - np.eye(n, dtype=np.float32)
        M[::2] *= -1.0
        M[:, ::2] *= -1.0
        for i in range(n):
            for j in range(i + 1, n):
                M[i, j] *= -1.0
    return jnp.asarray(M)


class HNNPallas:
    """Pallas re-implementation of HNN.forward / time_derivative semantics."""

    def __init__(self, input_dim, params, field_type="solenoidal",
                 baseline=False, assume_canonical_coords=True, use_bf16=False):
        # use_bf16 is recommended only on v6e/v7x; keep the f32 default on v5e.
        self.input_dim = input_dim
        self.half = input_dim // 2
        self.baseline = baseline
        self.field_type = field_type
        self.assume_canonical_coords = assume_canonical_coords
        self.M = permutation_tensor(input_dim, assume_canonical_coords)

        comp = jnp.bfloat16 if use_bf16 else jnp.float32

        # Pre-transpose the weights once so the kernel sees the lane-dense
        # layout with no in-kernel transposes.
        self._w1t = jnp.asarray(params["w1"]).T.astype(comp)        # [H, d_in]
        self._w2t = jnp.asarray(params["w2"]).T.astype(comp)        # [H, H]
        self._w3t = jnp.asarray(params["w3"]).T.astype(comp)        # [d_in, H]
        # Biases stay f32 (added onto the f32 MXU accumulator).
        self._b1 = jnp.asarray(params["b1"]).reshape(-1, 1).astype(jnp.float32)
        self._b2 = jnp.asarray(params["b2"]).reshape(-1, 1).astype(jnp.float32)
        self._b3 = jnp.asarray(params["b3"]).reshape(-1, 1).astype(jnp.float32)

    def _weights(self):
        return (self._w1t, self._b1, self._w2t, self._b2, self._w3t, self._b3)

    def forward(self, x):
        if self.baseline:
            # baseline path returns the full model output y = model(x)
            return _hnn_forward(x, *self._weights(), split=False, half=self.half)
        q, p = _hnn_forward(x, *self._weights(), split=True, half=self.half)
        assert q.ndim == 2 and q.shape[1] + p.shape[1] == self.input_dim, \
            "Output tensor should have shape [batch_size, input_dim]"
        # torch: y.split(1, 1), then cat of first-half / second-half columns
        return (q, p)

    def forward_transposed(self, x_t):
        """Optional zero-relayout API: x^T [d_in, batch] -> y^T [d_in, batch]."""
        return _hnn_forward_transposed(x_t, *self._weights())

    def time_derivative(self, x, t=None, separate_fields=False):
        """NEURAL ODE-STYLE VECTOR FIELD (matches torch: returns model(x))."""
        return _hnn_forward(x, *self._weights(), split=False, half=self.half)


def init_params(key, input_dim, hidden_dim):
    ks = jax.random.split(key, 6)

    def lin(kw, kb, fan_in, fan_out):
        bound = 1.0 / jnp.sqrt(fan_in)
        w = jax.random.uniform(kw, (fan_in, fan_out), jnp.float32, -bound, bound)
        b = jax.random.uniform(kb, (1, fan_out), jnp.float32, -bound, bound)
        return w, b

    w1, b1 = lin(ks[0], ks[1], input_dim, hidden_dim)
    w2, b2 = lin(ks[2], ks[3], hidden_dim, hidden_dim)
    w3, b3 = lin(ks[4], ks[5], hidden_dim, input_dim)
    return dict(w1=w1, b1=b1, w2=w2, b2=b2, w3=w3, b3=b3)


def _reference(x, params):
    h1 = jnp.tanh(x @ params["w1"] + params["b1"])
    h2 = jnp.tanh(h1 @ params["w2"] + params["b2"])
    return h2 @ params["w3"] + params["b3"]


if __name__ == "__main__":
    input_dim = 4     # args.input_dim
    hidden_dim = 32
    batch = 8
    half = input_dim // 2

    key = jax.random.PRNGKey(0)
    k_x, k_p = jax.random.split(key)
    x = jax.random.normal(k_x, (batch, input_dim), jnp.float32)
    params = init_params(k_p, input_dim, hidden_dim)
    y_ref = _reference(x, params)

    # f32 path: exact parity with the plain-JAX / PyTorch reference.
    hnn = HNNPallas(input_dim, params, baseline=False, use_bf16=False)
    out_q, out_p = hnn.forward(x)
    jax.block_until_ready((out_q, out_p))
    assert out_q.shape == (batch, half)
    assert out_p.shape == (batch, input_dim - half)
    assert jnp.allclose(out_q, y_ref[:, :half], atol=1e-5)
    assert jnp.allclose(out_p, y_ref[:, half:], atol=1e-5)

    # baseline=True returns the full model output.
    hnn_base = HNNPallas(input_dim, params, baseline=True, use_bf16=False)
    y_base = hnn_base.forward(x)
    jax.block_until_ready(y_base)
    assert y_base.shape == (batch, input_dim)
    assert jnp.allclose(y_base, y_ref, atol=1e-5)

    # time_derivative == model(x) (matches the torch module).
    td = hnn.time_derivative(x)
    jax.block_until_ready(td)
    assert jnp.allclose(td, y_ref, atol=1e-5)

    # Transposed-layout API (no wrapper relayout passes).
    y_t = hnn.forward_transposed(x.T)
    jax.block_until_ready(y_t)
    assert y_t.shape == (input_dim, batch)
    assert jnp.allclose(y_t, y_ref.T, atol=1e-5)

    # bf16 path (v6e/v7x optimization), batch=200 exercises the lane-padding
    # path and a 2-step grid (megacore on v7x); relaxed tolerance vs f32 ref.
    batch2 = 200
    x2 = jax.random.normal(jax.random.PRNGKey(1), (batch2, input_dim), jnp.float32)
    y_ref2 = _reference(x2, params)
    hnn_bf16 = HNNPallas(input_dim, params, baseline=False, use_bf16=True)
    q2, p2 = hnn_bf16.forward(x2)
    jax.block_until_ready((q2, p2))
    assert q2.shape == (batch2, half) and p2.shape == (batch2, input_dim - half)
    assert jnp.allclose(q2.astype(jnp.float32), y_ref2[:, :half], atol=3e-2)
    assert jnp.allclose(p2.astype(jnp.float32), y_ref2[:, half:], atol=3e-2)

    print("KERNEL_OK")
</pallas_src>

<mosaic_0001>
module attributes {stable_mosaic.version = 11 : i64} {
  func.func @_mlp_kernel(%arg0: i32, %arg1: memref<4x128xf32, #tpu.memory_space<vmem>>, %arg2: memref<32x4xf32, #tpu.memory_space<vmem>>, %arg3: memref<32x1xf32, #tpu.memory_space<vmem>>, %arg4: memref<32x32xf32, #tpu.memory_space<vmem>>, %arg5: memref<32x1xf32, #tpu.memory_space<vmem>>, %arg6: memref<4x32xf32, #tpu.memory_space<vmem>>, %arg7: memref<4x1xf32, #tpu.memory_space<vmem>>, %arg8: memref<4x128xf32, #tpu.memory_space<vmem>>) attributes {dimension_semantics = [#tpu.dimension_semantics<parallel>], iteration_bounds = array<i64: 1>, scalar_prefetch = 0 : i64, scratch_operands = 0 : i64, tpu.core_type = #tpu.core_type<tc>, window_params = [{transform_indices = @transform_0, window_bounds = array<i64: 4, 128>}, {pipeline_mode = #tpu.pipeline_mode<synchronous>, transform_indices = @transform_1, window_bounds = array<i64: 32, 4>}, {pipeline_mode = #tpu.pipeline_mode<synchronous>, transform_indices = @transform_2, window_bounds = array<i64: 32, 1>}, {pipeline_mode = #tpu.pipeline_mode<synchronous>, transform_indices = @transform_3, window_bounds = array<i64: 32, 32>}, {pipeline_mode = #tpu.pipeline_mode<synchronous>, transform_indices = @transform_4, window_bounds = array<i64: 32, 1>}, {pipeline_mode = #tpu.pipeline_mode<synchronous>, transform_indices = @transform_5, window_bounds = array<i64: 4, 32>}, {pipeline_mode = #tpu.pipeline_mode<synchronous>, transform_indices = @transform_6, window_bounds = array<i64: 4, 1>}, {transform_indices = @transform_7, window_bounds = array<i64: 4, 128>}]} {
    %c0 = arith.constant 0 : index
    %c0_0 = arith.constant 0 : index
    %0 = vector.load %arg1[%c0, %c0_0] : memref<4x128xf32, #tpu.memory_space<vmem>>, vector<4x128xf32>
    %c0_1 = arith.constant 0 : index
    %c0_2 = arith.constant 0 : index
    %1 = vector.load %arg2[%c0_1, %c0_2] : memref<32x4xf32, #tpu.memory_space<vmem>>, vector<32x4xf32>
    %cst = arith.constant dense<0.000000e+00> : vector<32x128xf32>
    %2 = tpu.matmul %1, %0, %cst {dimension_numbers = #tpu.dot_dimension_numbers<[1], [0], [0], [1], [0, 0, 1, 1], [], []>} : vector<32x4xf32>, vector<4x128xf32>, vector<32x128xf32> -> vector<32x128xf32>
    %c0_3 = arith.constant 0 : index
    %c0_4 = arith.constant 0 : index
    %3 = vector.load %arg3[%c0_3, %c0_4] : memref<32x1xf32, #tpu.memory_space<vmem>>, vector<32x1xf32>
    %4 = vector.broadcast %3 : vector<32x1xf32> to vector<32x128xf32>
    %5 = arith.addf %2, %4 : vector<32x128xf32>
    %6 = math.tanh %5 : vector<32x128xf32>
    %c0_5 = arith.constant 0 : index
    %c0_6 = arith.constant 0 : index
    %7 = vector.load %arg4[%c0_5, %c0_6] : memref<32x32xf32, #tpu.memory_space<vmem>>, vector<32x32xf32>
    %cst_7 = arith.constant dense<0.000000e+00> : vector<32x128xf32>
    %8 = tpu.matmul %7, %6, %cst_7 {dimension_numbers = #tpu.dot_dimension_numbers<[1], [0], [0], [1], [0, 0, 1, 1], [], []>} : vector<32x32xf32>, vector<32x128xf32>, vector<32x128xf32> -> vector<32x128xf32>
    %c0_8 = arith.constant 0 : index
    %c0_9 = arith.constant 0 : index
    %9 = vector.load %arg5[%c0_8, %c0_9] : memref<32x1xf32, #tpu.memory_space<vmem>>, vector<32x1xf32>
    %10 = vector.broadcast %9 : vector<32x1xf32> to vector<32x128xf32>
    %11 = arith.addf %8, %10 : vector<32x128xf32>
    %12 = math.tanh %11 : vector<32x128xf32>
    %c0_10 = arith.constant 0 : index
    %c0_11 = arith.constant 0 : index
    %13 = vector.load %arg6[%c0_10, %c0_11] : memref<4x32xf32, #tpu.memory_space<vmem>>, vector<4x32xf32>
    %cst_12 = arith.constant dense<0.000000e+00> : vector<4x128xf32>
    %14 = tpu.matmul %13, %12, %cst_12 {dimension_numbers = #tpu.dot_dimension_numbers<[1], [0], [0], [1], [0, 0, 1, 1], [], []>} : vector<4x32xf32>, vector<32x128xf32>, vector<4x128xf32> -> vector<4x128xf32>
    %c0_13 = arith.constant 0 : index
    %c0_14 = arith.constant 0 : index
    %15 = vector.load %arg7[%c0_13, %c0_14] : memref<4x1xf32, #tpu.memory_space<vmem>>, vector<4x1xf32>
    %16 = vector.broadcast %15 : vector<4x1xf32> to vector<4x128xf32>
    %17 = arith.addf %14, %16 : vector<4x128xf32>
    %c0_15 = arith.constant 0 : index
    %c0_16 = arith.constant 0 : index
    %18 = vector.load %arg8[%c0_15, %c0_16] : memref<4x128xf32, #tpu.memory_space<vmem>>, vector<4x128xf32>
    tpu.vector_store %arg8[%c0_15, %c0_16], %17 {strides = array<i32>} : memref<4x128xf32, #tpu.memory_space<vmem>>, vector<4x128xf32>,
    return
  }
  func.func @transform_0(%arg0: i32) -> (i32, i32) {
    %c0_i32 = arith.constant 0 : i32
    %c0_i32_0 = arith.constant 0 : i32
    return %c0_i32, %arg0 : i32, i32
  }
  func.func @transform_1(%arg0: i32) -> (i32, i32) {
    %c0_i32 = arith.constant 0 : i32
    %c0_i32_0 = arith.constant 0 : i32
    %c0_i32_1 = arith.constant 0 : i32
    return %c0_i32, %c0_i32_0 : i32, i32
  }
  func.func @transform_2(%arg0: i32) -> (i32, i32) {
    %c0_i32 = arith.constant 0 : i32
    %c0_i32_0 = arith.constant 0 : i32
    %c0_i32_1 = arith.constant 0 : i32
    return %c0_i32, %c0_i32_0 : i32, i32
  }
  func.func @transform_3(%arg0: i32) -> (i32, i32) {
    %c0_i32 = arith.constant 0 : i32
    %c0_i32_0 = arith.constant 0 : i32
    %c0_i32_1 = arith.constant 0 : i32
    return %c0_i32, %c0_i32_0 : i32, i32
  }
  func.func @transform_4(%arg0: i32) -> (i32, i32) {
    %c0_i32 = arith.constant 0 : i32
    %c0_i32_0 = arith.constant 0 : i32
    %c0_i32_1 = arith.constant 0 : i32
    return %c0_i32, %c0_i32_0 : i32, i32
  }
  func.func @transform_5(%arg0: i32) -> (i32, i32) {
    %c0_i32 = arith.constant 0 : i32
    %c0_i32_0 = arith.constant 0 : i32
    %c0_i32_1 = arith.constant 0 : i32
    return %c0_i32, %c0_i32_0 : i32, i32
  }
  func.func @transform_6(%arg0: i32) -> (i32, i32) {
    %c0_i32 = arith.constant 0 : i32
    %c0_i32_0 = arith.constant 0 : i32
    %c0_i32_1 = arith.constant 0 : i32
    return %c0_i32, %c0_i32_0 : i32, i32
  }
  func.func @transform_7(%arg0: i32) -> (i32, i32) {
    %c0_i32 = arith.constant 0 : i32
    %c0_i32_0 = arith.constant 0 : i32
    return %c0_i32, %arg0 : i32, i32
  }
}

</mosaic_0001>

<bundles_post_ra>
// kernel: _hnn_forward.1
= control target key start
LH: loop header
LB: loop body
LE: loop exit
PB: predicated region body
PF: predicated region fallthrough
CT: control target
= control target key end

     0   :  { %vm68_vm0 = vcmask 1043456   ;;  %vm55_vm1 = vcmask 31744   ;;  %v458_v3 = vmov 0   ;;  %vm189_vm2 = vcmask 261120   ;;  %s570_s0 = inlined_call_operand.vmem [shape: f32[4,128], index: 0, kind: input, shape index: {}]   ;;  %s571_s1 = inlined_call_operand.vmem [shape: f32[32,4], index: 1, kind: input, shape index: {}]   ;;  %s572_s2 = inlined_call_operand.vmem [shape: f32[32,1], index: 2, kind: input, shape index: {}]   ;;  %s573_s4 = inlined_call_operand.vmem [shape: f32[32,1], index: 4, kind: input, shape index: {}]   ;;  %s574_s6 = inlined_call_operand.vmem [shape: f32[4,1], index: 6, kind: input, shape index: {}]   ;;  %s575_s3 = inlined_call_operand.vmem [shape: f32[32,32], index: 3, kind: input, shape index: {}]   ;;  %s576_s5 = inlined_call_operand.vmem [shape: f32[4,32], index: 5, kind: input, shape index: {}]   ;;  %s577_s7 = inlined_call_operand.vmem [shape: f32[4,128], index: 7, kind: output, shape index: {}]  }
   0x1   :  { %v26_v0 = vld [vmem:[%s570_s0] sm:$0xf]  ;;  %v28_v2 = vld [vmem:[%s571_s1 + $0x8] sm:$0xff]  ;;  %440 = vset.pattern.permute.xlu0 %v458_v3  ;;  %441 = vset.pattern.permute.xlu1 %v458_v3  ;;  %v29_v4 = vld [vmem:[%s571_s1 + $0x10] sm:$0xff]  ;;  %v459_v35 = vmov 0.0   ;;  %vm460_vm3 = vmmov 0  }
   0x2   :  { %v27_v1 = vld [vmem:[%s571_s1] sm:$0xff]  ;;  %404 = vmatprep.subr.msk.mxu0 %vm68_vm0, %v26_v0  ;;  %v34_v5 = vld [vmem:[%s572_s2 + $0x18] sm:$0xff]  ;;  %v32_v6 = vld [vmem:[%s572_s2 + $0x8] sm:$0xff] }
   0x3   :  { %406 = vmatprep.mubr.msk.f32.mxu0 %vm55_vm1, %v27_v1  ;;  %405 = vmatpush3.msk.msra.mxu0 %vm68_vm0, %v26_v0  ;;  %v33_v7 = vld [vmem:[%s572_s2 + $0x10] sm:$0xff]  ;;  %v30_v8 = vld [vmem:[%s571_s1 + $0x18] sm:$0xff]  ;;  %v31_v9 = vld [vmem:[%s572_s2] sm:$0xff] }
   0x4   :  { %52 = vperm.xlu0 %440, %v34_v5   ;;  %407 = vmatmul.mubr.msk.f32.vlgmr.msra.gmra.mxu0 %vm55_vm1, %v28_v2  ;;  %v168_v10 = vld [vmem:[%s573_s4 + $0x18] sm:$0xff]  ;;  %v167_v11 = vld [vmem:[%s573_s4 + $0x10] sm:$0xff]  ;;  %v166_v12 = vld [vmem:[%s573_s4 + $0x8] sm:$0xff] }
   0x5   :  { %42 = vperm.xlu1 %441, %v32_v6   ;;  %409 = vmatprep.mubr.msk.f32.mxu0 %vm55_vm1, %v29_v4  ;;  %v165_v13 = vld [vmem:[%s573_s4] sm:$0xff]  ;;  %v162_v32 = vld [vmem:[%s575_s3 + $0x8] sm:$0xff]  ;;  %v163_v33 = vld [vmem:[%s575_s3 + $0x10] sm:$0xff] }
   0x6   :  { %v292_v14 = vld [vmem:[%s574_s6] sm:$0xf]  ;;  %v164_v34 = vld [vmem:[%s575_s3 + $0x18] sm:$0xff]  ;;  %426 = vmatprep.subr.mxu0 %v459_v35 }
   0x7   :  { %v161_v15 = vld [vmem:[%s575_s3] sm:$0xff] }
   0x8   :  { %47 = vperm.xlu0 %440, %v33_v7   ;;  %410 = vmatmul.mubr.msk.f32.gmra.mxu0 %vm55_vm1, %v30_v8  ;;  %v291_v51 = vld [vmem:[%s576_s5] sm:$0xf] }
   0x9   :  { %37 = vperm.xlu1 %441, %v31_v9   ;;  %420 = vmatprep.mubr.msk.f32.mxu1 %vm189_vm2, %v161_v15 }
   0xa   :  { %434 = vmatprep.mubr.msk.f32.mxu0 %vm460_vm3, %v459_v35 }
   0xc   :  { %186 = vperm.xlu0 %440, %v168_v10  }
   0xd   :  { %181 = vperm.xlu1 %441, %v167_v11  }
  0x10   :  { %176 = vperm.xlu0 %440, %v166_v12  }
  0x11   :  { %171 = vperm.xlu1 %441, %v165_v13  }
  0x14   :  { %295 = vperm.xlu0 %440, %v292_v14  }
  0x7f   :  { %v53_v16 = vpop.permute.xlu0 %52 }
  0x80   :  { %v43_v18 = vpop.permute.xlu1 %42 }
  0x83   :  { %v48_v22 = vpop.permute.xlu0 %47 }
  0x84   :  { %v38_v26 = vpop.permute.xlu1 %37 }
  0x87   :  { %v187_v36 = vpop.permute.xlu0 %186 }
  0x88   :  { %v182_v38 = vpop.permute.xlu1 %181 }
  0x8b   :  { %v177_v42 = vpop.permute.xlu0 %176 }
  0x8c   :  { %v172_v46 = vpop.permute.xlu1 %171 }
  0x8f   :  { %v296_v53 = vpop.permute.xlu0 %295 }
  0xc4   :  { %v408_v17 = vpop.f32.mrf.mxu0 }
  0xc5   :  { %v144_v24 = vadd.f32 %v408_v17, %v43_v18 }
  0xc6   :  { %v138_v19 = vpop.f32.mrf.mxu0 }
  0xc7   :  { %v139_v27 = vadd.f32 %v138_v19, %v38_v26 }
  0xc8   :  { %v411_v20 = vpop.f32.mrf.mxu0 }
  0xc9   :  { %v154_v21 = vadd.f32 %v411_v20, %v53_v16 }
  0xca   :  { %v148_v23 = vpop.f32.mrf.mxu0 }
  0xcb   :  { %442 = vtanh.f32 %v154_v21  ;;  %v149_v25 = vadd.f32 %v148_v23, %v48_v22 }
  0xcd   :  { %444 = vtanh.f32 %v149_v25 }
  0xce   :  { %446 = vtanh.f32 %v144_v24 }
  0xcf   :  { %448 = vtanh.f32 %v139_v27 }
  0xd8   :  { %v443_v28 = vpop.eup %442 }
  0xd9   :  { %412 = vmatprep.subr.mxu1 %v443_v28 }
  0xda   :  { %v445_v29 = vpop.eup %444  ;;  %413 = vmatpush3.msra.mxu1 %v443_v28 }
  0xdb   :  { %414 = vmatprep.subr.mxu1 %v445_v29  ;;  %v447_v30 = vpop.eup %446 }
  0xdc   :  { %415 = vmatpush3.msra.mxu1 %v445_v29  ;;  %v449_v31 = vpop.eup %448 }
  0xdd   :  { %416 = vmatprep.subr.mxu1 %v447_v30 }
  0xde   :  { %417 = vmatpush3.msra.mxu1 %v447_v30 }
  0xdf   :  { %418 = vmatprep.subr.mxu1 %v449_v31 }
  0xe0   :  { %419 = vmatpush3.msra.mxu1 %v449_v31 }
  0xe1   :  { %421 = vmatmul.mubr.msk.f32.vlgmr.msra.gmra.mxu1 %vm189_vm2, %v162_v32 }
  0xe2   :  { %423 = vmatprep.mubr.msk.f32.mxu1 %vm189_vm2, %v163_v33 }
  0xe5   :  { %424 = vmatmul.mubr.msk.f32.gmra.mxu1 %vm189_vm2, %v164_v34 }
 0x1a1   :  { %v422_v37 = vpop.f32.mrf.mxu1 }
 0x1a2   :  { %v274_v44 = vadd.f32 %v422_v37, %v177_v42 }
 0x1a3   :  { %v268_v39 = vpop.f32.mrf.mxu1 }
 0x1a4   :  { %v269_v47 = vadd.f32 %v268_v39, %v172_v46 }
 0x1a5   :  { %v425_v40 = vpop.f32.mrf.mxu1 }
 0x1a6   :  { %v284_v41 = vadd.f32 %v425_v40, %v187_v36 }
 0x1a7   :  { %v278_v43 = vpop.f32.mrf.mxu1 }
 0x1a8   :  { %450 = vtanh.f32 %v284_v41  ;;  %v279_v45 = vadd.f32 %v278_v43, %v182_v38 }
 0x1aa   :  { %452 = vtanh.f32 %v279_v45 }
 0x1ab   :  { %454 = vtanh.f32 %v274_v44 }
 0x1ac   :  { %456 = vtanh.f32 %v269_v47 }
 0x1b5   :  { %v451_v48 = vpop.eup %450 }
 0x1b6   :  { %427 = vmatpush3.msra.mxu0 %v451_v48 }
 0x1b7   :  { %v453_v49 = vpop.eup %452  ;;  %428 = vmatprep.subr.mxu0 %v459_v35 }
 0x1b8   :  { %429 = vmatpush3.msra.mxu0 %v453_v49  ;;  %v455_v50 = vpop.eup %454 }
 0x1b9   :  { %430 = vmatprep.subr.mxu0 %v459_v35  ;;  %v457_v52 = vpop.eup %456 }
 0x1ba   :  { %431 = vmatpush3.msra.mxu0 %v455_v50 }
 0x1bb   :  { %432 = vmatprep.subr.mxu0 %v459_v35 }
 0x1bc   :  { %433 = vmatpush3.msra.mxu0 %v457_v52 }
 0x1bd   :  { %435 = vmatmul.mubr.msk.f32.vlgmr.msra.gmra.mxu0 %vm189_vm2, %v291_v51 }
 0x27d   :  { %v367_v54 = vpop.f32.mrf.mxu0 }
 0x27e   :  { %v368_v55 = vadd.f32 %v367_v54, %v296_v53 }
 0x27f   :  { %v436_v56 = vpop.f32.mrf.mxu0 }
 0x280   :  { %371 = vst [vmem:[%s577_s7] sm:$0xf] %v368_v55 }

</bundles_post_ra>
